<compile_context>
chip_gen: v6e
topology: v6e:2x2x1
jax: 0.10.0
libtpu: 0.0.40
codegen_flags: <defaults>
</compile_context>

<pallas_src>
import functools

import jax
import jax.numpy as jnp
from jax.experimental import pallas as pl
from jax.experimental.pallas import tpu as pltpu

LN_EPS = 1e-5  # PyTorch nn.LayerNorm default


def _round_up(x, m):
    return ((x + m - 1) // m) * m


def _pick_tile(dim_padded, max_tile, align):
    """Largest multiple of `align` that divides `dim_padded` and is <= max_tile."""
    t = max(align, (min(max_tile, dim_padded) // align) * align)
    while dim_padded % t:
        t -= align
    return t


def _vmem_budget_bytes():
    """Per-TensorCore VMEM budget with ~25% headroom for compiler scratch / semaphores."""
    try:
        cap = pltpu.get_tpu_info().vmem_capacity_bytes
    except Exception:
        cap = 64 * 1024 * 1024  # most conservative generation (v7x: 64 MiB / TC)
    return max(16 * 1024 * 1024, min(int(cap * 3 // 4), 100 * 1024 * 1024))


def _select_tiles(n_rows, in_p, out_p, out_bytes, budget, tile_n_target=256):
    """Pick (tile_n, tile_out, w_buffers) so the pipelined working set fits `budget`."""
    if n_rows >= tile_n_target:
        tile_n = tile_n_target
    else:
        # Pad tiny row counts up to a multiple of 16 (bf16 sublane tile) instead of shrinking below.
        tile_n = _round_up(max(n_rows, 16), 16)

    def fits(tn, to, w_bufs):
        need = (2 * tn * in_p * 4            # x row tile, f32, double-buffered
                + 2 * 2 * in_p * 4           # gamma + beta
                + w_bufs * in_p * to * 2     # bf16 weight slab(s)
                + 2 * to * 4                 # bias slab
                + 2 * tn * to * out_bytes    # output tile, double-buffered
                + tn * in_p * 2)             # cached x_norm bf16 scratch
        return need <= budget

    # Preferred: full weight resident -> weight DMA'd from HBM exactly once for the whole grid.
    if fits(tile_n, out_p, 2):
        return tile_n, out_p, 2

    # Fall back to tiling out_hsz; 3-deep buffering hides the per-step weight-slab DMA.
    tile_out = _pick_tile(out_p, 2048, 128)
    while tile_out > 128 and not fits(tile_n, tile_out, 3):
        tile_out = _pick_tile(out_p, tile_out - 128, 128)
    while tile_n > 16 and not fits(tile_n, tile_out, 3):
        tile_n = max(16, tile_n // 2)
    # TODO(synk): if even (tile_n=16, tile_out=128) does not fit (very large in_hsz), add a
    # trailing "arbitrary" K-reduction grid axis with an f32 accumulator scratch.
    return tile_n, tile_out, 3


def _linear_wrapper_kernel(x_ref, gamma_ref, beta_ref, w_ref, b_ref, o_ref, xn_ref,
                           *, inv_n, n_valid, in_padded, mxu_dtype):
    # ---- LayerNorm, computed once per row tile (j == 0) and cached as bf16 in VMEM ----
    @pl.when(pl.program_id(1) == 0)
    def _():
        x = x_ref[...].astype(jnp.float32)                     # (tile_n, in_p)
        mean = jnp.sum(x, axis=-1, keepdims=True) * inv_n      # padded lanes of x are zero
        xc = x - mean
        if in_padded:
            # Two-pass (centered) variance: keep padded lanes out of the sum of squares.
            lane = jax.lax.broadcasted_iota(jnp.int32, (1, x.shape[-1]), 1)
            xc = jnp.where(lane < n_valid, xc, 0.0)
        var = jnp.sum(xc * xc, axis=-1, keepdims=True) * inv_n
        # gamma folded into the rsqrt scale; padded gamma/beta lanes are zero -> no leakage.
        scale = gamma_ref[...] * jax.lax.rsqrt(var + LN_EPS)   # (tile_n, in_p)
        xn_ref[...] = (xc * scale + beta_ref[...]).astype(mxu_dtype)

    # ---- Dropout: identity in eval mode (PyTorch only masks/scales during training) ----
    # TODO(synk): training-mode dropout (pltpu.prng_seed + prng_random_bits mask) not implemented.

    # ---- Linear on the MXU (bf16 x bf16 -> f32 accumulate) + bias + ReLU epilogue ----
    y = jnp.dot(xn_ref[...], w_ref[...], preferred_element_type=jnp.float32)
    o_ref[...] = jnp.maximum(y + b_ref[...], 0.0).astype(o_ref.dtype)


def prepare_params(gamma, beta, w_t, b, *, mxu_dtype=jnp.bfloat16):
    """One-time pad + cast of the static parameters (do NOT redo this per forward call).

    gamma, beta : (in_hsz,) or (1, in_hsz)   LayerNorm weight / bias
    w_t         : (in_hsz, out_hsz)          Linear weight, pre-transposed (torch stores (out, in))
    b           : (out_hsz,) or (1, out_hsz) Linear bias
    """
    in_hsz, out_hsz = w_t.shape
    in_p, out_p = _round_up(in_hsz, 128), _round_up(out_hsz, 128)

    gamma = jnp.asarray(gamma, jnp.float32).reshape(1, in_hsz)
    beta = jnp.asarray(beta, jnp.float32).reshape(1, in_hsz)
    bias = jnp.asarray(b, jnp.float32).reshape(1, out_hsz)
    w = jnp.asarray(w_t, mxu_dtype)

    if in_p != in_hsz:
        gamma = jnp.zeros((1, in_p), jnp.float32).at[:, :in_hsz].set(gamma)
        beta = jnp.zeros((1, in_p), jnp.float32).at[:, :in_hsz].set(beta)
    if (in_p, out_p) != (in_hsz, out_hsz):
        w = jnp.zeros((in_p, out_p), mxu_dtype).at[:in_hsz, :out_hsz].set(w)
    if out_p != out_hsz:
        bias = jnp.zeros((1, out_p), jnp.float32).at[:, :out_hsz].set(bias)

    return dict(gamma=gamma, beta=beta, w=w, b=bias,
                in_hsz=in_hsz, out_hsz=out_hsz, in_p=in_p, out_p=out_p,
                mxu_dtype=mxu_dtype)


def linear_wrapper_forward(x, params, *, out_dtype=None, tile_n=256):
    """Fused LayerNorm -> (eval) Dropout -> Linear -> ReLU.   x: (N, in_hsz), rows = batch*seq."""
    N, in_hsz = x.shape
    assert in_hsz == params["in_hsz"], "x feature dim does not match prepared params"
    in_p, out_p, out_hsz = params["in_p"], params["out_p"], params["out_hsz"]
    mxu_dtype = params["mxu_dtype"]
    out_dtype = out_dtype or x.dtype

    budget = _vmem_budget_bytes()
    tile_n, tile_out, w_bufs = _select_tiles(
        N, in_p, out_p, jnp.dtype(out_dtype).itemsize, budget, tile_n_target=tile_n)
    n_p = _round_up(N, tile_n)

    # Skip the host-side pad copy entirely when x is already aligned.
    if (n_p, in_p) == (N, in_hsz):
        x_p = x
    else:
        x_p = jnp.zeros((n_p, in_p), x.dtype).at[:N, :in_hsz].set(x)

    grid = (n_p // tile_n, out_p // tile_out)

    w_spec_kwargs = {}
    if grid[1] > 1:
        # Weight is the only operand whose block index changes every inner step; deepen its buffer
        # so its HBM DMA is hidden behind the matmul of the previous slab.
        w_spec_kwargs["pipeline_mode"] = pl.Buffered(w_bufs)

    kernel = functools.partial(
        _linear_wrapper_kernel,
        inv_n=1.0 / in_hsz, n_valid=in_hsz, in_padded=(in_p != in_hsz),
        mxu_dtype=mxu_dtype)

    out_padded = pl.pallas_call(
        kernel,
        out_shape=jax.ShapeDtypeStruct((n_p, out_p), out_dtype),
        grid_spec=pltpu.PrefetchScalarGridSpec(
            num_scalar_prefetch=0,
            grid=grid,
            in_specs=[
                pl.BlockSpec((tile_n, in_p), lambda i, j: (i, 0)),     # x row tile (resident over j)
                pl.BlockSpec((1, in_p), lambda i, j: (0, 0)),          # gamma
                pl.BlockSpec((1, in_p), lambda i, j: (0, 0)),          # beta
                pl.BlockSpec((in_p, tile_out), lambda i, j: (0, j),    # W^T slab (resident if 1 tile)
                             **w_spec_kwargs),
                pl.BlockSpec((1, tile_out), lambda i, j: (0, j)),      # bias slab
            ],
            out_specs=pl.BlockSpec((tile_n, tile_out), lambda i, j: (i, j)),
            scratch_shapes=[pltpu.VMEM((tile_n, in_p), mxu_dtype)],    # cached x_norm (bf16)
        ),
        compiler_params=pltpu.CompilerParams(
            # rows: parallel (megacore shards across TCs on v7x);
            # out tiles: arbitrary (this axis carries the x_norm scratch computed at j == 0).
            dimension_semantics=("parallel", "arbitrary"),
            vmem_limit_bytes=budget,
        ),
    )(x_p, params["gamma"], params["beta"], params["w"], params["b"])

    if (n_p, out_p) == (N, out_hsz):
        return out_padded
    return out_padded[:N, :out_hsz]


if __name__ == "__main__":
    # Small shapes consistent with the module: (batch, seq, in_hsz) -> (batch, seq, out_hsz)
    batch, seq, in_hsz, out_hsz = 2, 8, 32, 64

    key = jax.random.PRNGKey(0)
    kx, kw, kb = jax.random.split(key, 3)

    x = jax.random.normal(kx, (batch, seq, in_hsz), dtype=jnp.float32)

    # Deterministic parameter init (shapes from nn.LayerNorm(in_hsz), nn.Linear(in_hsz, out_hsz))
    gamma = jnp.ones((in_hsz,), jnp.float32)      # LayerNorm weight init
    beta = jnp.zeros((in_hsz,), jnp.float32)      # LayerNorm bias init
    bound = in_hsz ** -0.5
    w = jax.random.uniform(kw, (out_hsz, in_hsz), jnp.float32, -bound, bound)  # torch Linear layout
    b = jax.random.uniform(kb, (out_hsz,), jnp.float32, -bound, bound)

    # Pad + bf16-cast the static parameters ONCE (not per forward call).
    params = prepare_params(gamma, beta, w.T, b)

    x2d = x.reshape(batch * seq, in_hsz)
    out2d = linear_wrapper_forward(x2d, params)
    out = out2d.reshape(batch, seq, out_hsz)
    jax.block_until_ready(out)

    # Pure-JAX f32 reference. Kernel uses bf16 MXU operands with f32 accumulation, so compare
    # with a tolerance that covers bf16 rounding of the normalized activations/weights.
    mean = jnp.mean(x, axis=-1, keepdims=True)
    var = jnp.mean((x - mean) ** 2, axis=-1, keepdims=True)
    xn = (x - mean) / jnp.sqrt(var + LN_EPS) * gamma + beta
    ref = jnp.maximum(xn @ w.T + b, 0.0)
    assert out.shape == ref.shape
    assert jnp.allclose(out, ref, atol=2e-2, rtol=2e-2), "mismatch vs reference"

    print("KERNEL_OK")
</pallas_src>

<mosaic_0001>
module attributes {stable_mosaic.version = 11 : i64} {
  func.func @_linear_wrapper_kernel(%arg0: i32, %arg1: i32, %arg2: memref<16x128xf32, #tpu.memory_space<vmem>>, %arg3: memref<1x128xf32, #tpu.memory_space<vmem>>, %arg4: memref<1x128xf32, #tpu.memory_space<vmem>>, %arg5: memref<128x128xbf16, #tpu.memory_space<vmem>>, %arg6: memref<1x128xf32, #tpu.memory_space<vmem>>, %arg7: memref<16x128xf32, #tpu.memory_space<vmem>>, %arg8: memref<16x128xbf16, #tpu.memory_space<vmem>>) attributes {dimension_semantics = [#tpu.dimension_semantics<parallel>, #tpu.dimension_semantics<arbitrary>], iteration_bounds = array<i64: 1, 1>, scalar_prefetch = 0 : i64, scratch_operands = 1 : i64, tpu.core_type = #tpu.core_type<tc>, window_params = [{transform_indices = @transform_0, window_bounds = array<i64: 16, 128>}, {pipeline_mode = #tpu.pipeline_mode<synchronous>, transform_indices = @transform_1, window_bounds = array<i64: 1, 128>}, {pipeline_mode = #tpu.pipeline_mode<synchronous>, transform_indices = @transform_2, window_bounds = array<i64: 1, 128>}, {transform_indices = @transform_3, window_bounds = array<i64: 128, 128>}, {transform_indices = @transform_4, window_bounds = array<i64: 1, 128>}, {transform_indices = @transform_5, window_bounds = array<i64: 16, 128>}]} {
    %c0_i32 = arith.constant 0 : i32
    %0 = arith.cmpi eq, %arg1, %c0_i32 : i32
    %1 = arith.extui %0 : i1 to i32
    %c0_i32_0 = arith.constant 0 : i32
    %2 = arith.cmpi ne, %1, %c0_i32_0 : i32
    scf.if %2 {
      %c0_9 = arith.constant 0 : index
      %c0_10 = arith.constant 0 : index
      %12 = vector.load %arg2[%c0_9, %c0_10] : memref<16x128xf32, #tpu.memory_space<vmem>>, vector<16x128xf32>
      %cst_11 = arith.constant dense<0.000000e+00> : vector<16xf32>
      %13 = vector.multi_reduction <add>, %12, %cst_11 [1] : vector<16x128xf32> to vector<16xf32>
      %14 = vector.shape_cast %13 : vector<16xf32> to vector<16x1xf32>
      %cst_12 = arith.constant 3.125000e-02 : f32
      %15 = vector.broadcast %cst_12 : f32 to vector<16x1xf32>
      %16 = arith.mulf %14, %15 : vector<16x1xf32>
      %17 = vector.broadcast %16 : vector<16x1xf32> to vector<16x128xf32>
      %18 = arith.subf %12, %17 : vector<16x128xf32>
      %19 = tpu.iota {dimensions = array<i32: 1>} : vector<1x128xi32>
      %c32_i32 = arith.constant 32 : i32
      %20 = vector.broadcast %c32_i32 : i32 to vector<1x128xi32>
      %21 = arith.cmpi slt, %19, %20 : vector<1x128xi32>
      %cst_13 = arith.constant 0.000000e+00 : f32
      %22 = vector.shape_cast %21 : vector<1x128xi1> to vector<1x128xi1>
      %23 = vector.broadcast %22 : vector<1x128xi1> to vector<16x128xi1>
      %24 = vector.broadcast %cst_13 : f32 to vector<16x128xf32>
      %25 = arith.select %23, %18, %24 : vector<16x128xi1>, vector<16x128xf32>
      %26 = arith.mulf %25, %25 : vector<16x128xf32>
      %cst_14 = arith.constant dense<0.000000e+00> : vector<16xf32>
      %27 = vector.multi_reduction <add>, %26, %cst_14 [1] : vector<16x128xf32> to vector<16xf32>
      %28 = vector.shape_cast %27 : vector<16xf32> to vector<16x1xf32>
      %cst_15 = arith.constant 3.125000e-02 : f32
      %29 = vector.broadcast %cst_15 : f32 to vector<16x1xf32>
      %30 = arith.mulf %28, %29 : vector<16x1xf32>
      %c0_16 = arith.constant 0 : index
      %c0_17 = arith.constant 0 : index
      %31 = vector.load %arg3[%c0_16, %c0_17] : memref<1x128xf32, #tpu.memory_space<vmem>>, vector<1x128xf32>
      %cst_18 = arith.constant 9.99999974E-6 : f32
      %32 = vector.broadcast %cst_18 : f32 to vector<16x1xf32>
      %33 = arith.addf %30, %32 : vector<16x1xf32>
      %34 = math.rsqrt %33 : vector<16x1xf32>
      %35 = vector.broadcast %31 : vector<1x128xf32> to vector<16x128xf32>
      %36 = vector.broadcast %34 : vector<16x1xf32> to vector<16x128xf32>
      %37 = arith.mulf %35, %36 : vector<16x128xf32>
      %38 = arith.mulf %25, %37 : vector<16x128xf32>
      %c0_19 = arith.constant 0 : index
      %c0_20 = arith.constant 0 : index
      %39 = vector.load %arg4[%c0_19, %c0_20] : memref<1x128xf32, #tpu.memory_space<vmem>>, vector<1x128xf32>
      %40 = vector.broadcast %39 : vector<1x128xf32> to vector<16x128xf32>
      %41 = arith.addf %38, %40 : vector<16x128xf32>
      %42 = arith.truncf %41 : vector<16x128xf32> to vector<16x128xbf16>
      %c0_21 = arith.constant 0 : index
      %c0_22 = arith.constant 0 : index
      %43 = vector.load %arg8[%c0_21, %c0_22] : memref<16x128xbf16, #tpu.memory_space<vmem>>, vector<16x128xbf16>
      tpu.vector_store %arg8[%c0_21, %c0_22], %42 {strides = array<i32>} : memref<16x128xbf16, #tpu.memory_space<vmem>>, vector<16x128xbf16>,
    } else {
    }
    %c0 = arith.constant 0 : index
    %c0_1 = arith.constant 0 : index
    %3 = vector.load %arg8[%c0, %c0_1] : memref<16x128xbf16, #tpu.memory_space<vmem>>, vector<16x128xbf16>
    %c0_2 = arith.constant 0 : index
    %c0_3 = arith.constant 0 : index
    %4 = vector.load %arg5[%c0_2, %c0_3] : memref<128x128xbf16, #tpu.memory_space<vmem>>, vector<128x128xbf16>
    %cst = arith.constant dense<0.000000e+00> : vector<16x128xf32>
    %5 = tpu.matmul %3, %4, %cst {dimension_numbers = #tpu.dot_dimension_numbers<[1], [0], [0], [1], [0, 0, 1, 1], [], []>} : vector<16x128xbf16>, vector<128x128xbf16>, vector<16x128xf32> -> vector<16x128xf32>
    %c0_4 = arith.constant 0 : index
    %c0_5 = arith.constant 0 : index
    %6 = vector.load %arg6[%c0_4, %c0_5] : memref<1x128xf32, #tpu.memory_space<vmem>>, vector<1x128xf32>
    %7 = vector.broadcast %6 : vector<1x128xf32> to vector<16x128xf32>
    %8 = arith.addf %5, %7 : vector<16x128xf32>
    %cst_6 = arith.constant 0.000000e+00 : f32
    %9 = vector.broadcast %cst_6 : f32 to vector<16x128xf32>
    %10 = arith.maximumf %8, %9 : vector<16x128xf32>
    %c0_7 = arith.constant 0 : index
    %c0_8 = arith.constant 0 : index
    %11 = vector.load %arg7[%c0_7, %c0_8] : memref<16x128xf32, #tpu.memory_space<vmem>>, vector<16x128xf32>
    tpu.vector_store %arg7[%c0_7, %c0_8], %10 {strides = array<i32>} : memref<16x128xf32, #tpu.memory_space<vmem>>, vector<16x128xf32>,
    return
  }
  func.func @transform_0(%arg0: i32, %arg1: i32) -> (i32, i32) {
    %c0_i32 = arith.constant 0 : i32
    %c0_i32_0 = arith.constant 0 : i32
    return %arg0, %c0_i32 : i32, i32
  }
  func.func @transform_1(%arg0: i32, %arg1: i32) -> (i32, i32) {
    %c0_i32 = arith.constant 0 : i32
    %c0_i32_0 = arith.constant 0 : i32
    %c0_i32_1 = arith.constant 0 : i32
    return %c0_i32, %c0_i32_0 : i32, i32
  }
  func.func @transform_2(%arg0: i32, %arg1: i32) -> (i32, i32) {
    %c0_i32 = arith.constant 0 : i32
    %c0_i32_0 = arith.constant 0 : i32
    %c0_i32_1 = arith.constant 0 : i32
    return %c0_i32, %c0_i32_0 : i32, i32
  }
  func.func @transform_3(%arg0: i32, %arg1: i32) -> (i32, i32) {
    %c0_i32 = arith.constant 0 : i32
    %c0_i32_0 = arith.constant 0 : i32
    return %c0_i32, %arg1 : i32, i32
  }
  func.func @transform_4(%arg0: i32, %arg1: i32) -> (i32, i32) {
    %c0_i32 = arith.constant 0 : i32
    %c0_i32_0 = arith.constant 0 : i32
    return %c0_i32, %arg1 : i32, i32
  }
  func.func @transform_5(%arg0: i32, %arg1: i32) -> (i32, i32) {
    %c0_i32 = arith.constant 0 : i32
    return %arg0, %arg1 : i32, i32
  }
}

</mosaic_0001>

<bundles_post_ra>
// kernel: tpu_custom_call.1
= control target key start
LH: loop header
LB: loop body
LE: loop exit
PB: predicated region body
PF: predicated region fallthrough
CT: control target
= control target key end

     0   :  { %10 = vsyncpa [#allocation4], 0  ;;  %s456_s0 = inlined_call_operand.hbm [shape: f32[16,128], index: 0, kind: input, shape index: {}]   ;;  %s457_s1 = inlined_call_operand.vmem [shape: f32[1,128], index: 1, kind: input, shape index: {}]   ;;  %s458_s2 = inlined_call_operand.vmem [shape: f32[1,128], index: 2, kind: input, shape index: {}]   ;;  %s459_s3 = inlined_call_operand.hbm [shape: bf16[128,128], index: 3, kind: input, shape index: {}]   ;;  %s460_s4 = inlined_call_operand.vmem [shape: f32[1,128], index: 4, kind: input, shape index: {}]   ;;  %s461_s5 = inlined_call_operand.hbm [shape: f32[16,128], index: 5, kind: output, shape index: {}]  }
   0x1   :  { %11 = vsyncpa [#allocation7], 0 }
   0x2   :  { %12 = vsyncpa [#allocation5], 0  ;;  %s393_s18 = smov [#allocation3]  }
   0x3   :  { %s18_s19 = sshll.u32 %s393_s18, 4  ;;  %s19_s19 = int_to_ptr.vmem [resolvable:$true] %s18_s19 }
   0x4   :  { %s335_s20 = scalar_lea.vmem %s19_s19, 256  ;;  %p340_p1 = scmp.lt.s32.totalorder %s19_s19, %s19_s19 }
   0x5   :  { %p336_p0 = scmp.ne.s32.totalorder %s19_s19, %s335_s20  ;;  %p341_p2 = scmp.lt.s32.totalorder %s335_s20, %s335_s20 }
   0x7   :  { %p342_p3 = por %p341_p2, %p340_p1 }
   0x9   :  { %p343_p4 = pnand %p342_p3, %p336_p0 }
   0xb   :  { %346 = shalt.err (!%p343_p4)
}
   0xc   :  { %s394_s21 = smov 128   ;;  %s395_s22 = smov 8  }
   0xd   :  { %24 = dma.hbm_to_vmem [thread:$0]  %s456_s0, 256, %s19_s19, [#allocation4], %s394_s21, %s394_s21, %s395_s22  }
   0xe   :  { %s396_s25 = smov [#allocation6]  }
   0xf   :  { %s34_s26 = sshll.u32 %s396_s25, 4  ;;  %s35_s26 = int_to_ptr.vmem [resolvable:$true] %s34_s26 }
  0x10   :  { %s355_s27 = scalar_lea.vmem %s35_s26, 1024  ;;  %p360_p6 = scmp.lt.s32.totalorder %s35_s26, %s35_s26 }
  0x11   :  { %p356_p5 = scmp.ne.s32.totalorder %s35_s26, %s355_s27  ;;  %p361_p7 = scmp.lt.s32.totalorder %s355_s27, %s355_s27 }
  0x13   :  { %p362_p8 = por %p361_p7, %p360_p6 }
  0x15   :  { %p363_p9 = pnand %p362_p8, %p356_p5 }
  0x17   :  { %366 = shalt.err (!%p363_p9)
}
  0x18   :  { %s397_s28 = smov 64   ;;  %s398_s29 = smov 4  }
  0x19   :  { %40 = dma.hbm_to_vmem [thread:$0]  %s459_s3, 1024, %s35_s26, [#allocation7], %s397_s28, %s397_s28, %s398_s29  }
  0x1a   :  { %387 = dma.done.wait [#allocation4], 256  }
  0x1b   :  { %388 = vsyncadd [#allocation4], 4294967040 }
  0x1c   :  { %389 = dma.done.wait [#allocation7], 1024  }
  0x1d   :  { %390 = vsyncadd [#allocation7], 4294966272  ;;  %v54_v0 = vld [vmem:[#allocation3] sm:$0xff]  ;;  %v55_v1 = vld [vmem:[#allocation3 + $0x8] sm:$0xff]  ;;  %v64_v2 = vlaneseq  ;;  %v399_v15 = vmov 0.0   ;;  %vm400_vm1 = vmmov 0  }
  0x1e   :  { %56 = vadd.xlane.f32.xlu0 %v54_v0  ;;  %v314_v14 = vld [vmem:[#allocation6 + $0x38] sm:$0xff]   ;;  %285 = vmatprep.subr.bf16.mxu0 %v399_v15  ;;  %v315_v16 = vld [vmem:[#allocation6 + $0x30] sm:$0xff]   ;;  %v316_v17 = vld [vmem:[#allocation6 + $0x28] sm:$0xff]  }
  0x1f   :  { %v65_v3 = vand.u32 127, %v64_v2  ;;  %286 = vmatpush3.bf16.msra.mxu0 %v314_v14  ;;  %v317_v18 = vld [vmem:[#allocation6 + $0x20] sm:$0xff]   ;;  %v318_v19 = vld [vmem:[#allocation6 + $0x18] sm:$0xff]   ;;  %v319_v20 = vld [vmem:[#allocation6 + $0x10] sm:$0xff]   ;;  %301 = vmatprep.mubr.msk.bf16.mxu0 %vm400_vm1, %v399_v15 }
  0x20   :  { %287 = vmatprep.subr.bf16.mxu0 %v399_v15  ;;  %v320_v21 = vld [vmem:[#allocation6 + $0x8] sm:$0xff]   ;;  %v321_v22 = vld [vmem:[#allocation6] sm:$0xff]  }
  0x21   :  { %vm66_vm0 = vcmp.lt.s32.totalorder %v65_v3, 32  ;;  %v255_v29 = vld [vmem:[%s457_s1] ss:$0 sm:$0xff]  ;;  %s401_s1 = smov [#allocation8]  }
  0x22   :  { %58 = vadd.xlane.f32.xlu0 %v55_v1  ;;  %v256_v35 = vld [vmem:[%s458_s2] ss:$0 sm:$0xff]  ;;  %s242_s11 = sshll.u32 %s401_s1, 4  ;;  %s243_s11 = int_to_ptr.vmem [resolvable:$true] %s242_s11 }
  0x23   :  { %288 = vmatpush3.bf16.msra.mxu0 %v315_v16  ;;  %v259_v41 = vld [vmem:[%s460_s4] ss:$0 sm:$0xff]  ;;  %s367_s2 = scalar_lea.vmem %s243_s11, 256  ;;  %p372_p11 = scmp.lt.s32.totalorder %s243_s11, %s243_s11 }
  0x24   :  { %289 = vmatprep.subr.bf16.mxu0 %v399_v15  ;;  %p368_p10 = scmp.ne.s32.totalorder %s243_s11, %s367_s2  ;;  %p373_p12 = scmp.lt.s32.totalorder %s367_s2, %s367_s2 }
  0x26   :  { %p374_p13 = por %p373_p12, %p372_p11 }
  0x27   :  { %290 = vmatpush3.bf16.msra.mxu0 %v316_v17 }
  0x28   :  { %291 = vmatprep.subr.bf16.mxu0 %v399_v15  ;;  %p375_p0 = pnand %p374_p13, %p368_p10 }
  0x2b   :  { %292 = vmatpush3.bf16.msra.mxu0 %v317_v18 }
  0x2c   :  { %293 = vmatprep.subr.bf16.mxu0 %v399_v15 }
  0x2f   :  { %294 = vmatpush3.bf16.msra.mxu0 %v318_v19 }
  0x30   :  { %295 = vmatprep.subr.bf16.mxu0 %v399_v15 }
  0x33   :  { %296 = vmatpush3.bf16.msra.mxu0 %v319_v20 }
  0x34   :  { %297 = vmatprep.subr.bf16.mxu0 %v399_v15 }
  0x37   :  { %298 = vmatpush3.bf16.msra.mxu0 %v320_v21 }
  0x38   :  { %299 = vmatprep.subr.bf16.mxu0 %v399_v15 }
  0x3b   :  { %300 = vmatpush3.bf16.msra.mxu0 %v321_v22 }
  0xa7   :  { %v57_v4 = vpop.xlane.xlu0 %56 }
  0xa8   :  { %v60_v5 = vmul.f32 0.03125, %v57_v4 }
  0xaa   :  { %v62_v6 = vsub.f32 %v54_v0, %v60_v5 }
  0xab   :  { %v59_v7 = vpop.xlane.xlu0 %58 }
  0xac   :  { %v61_v8 = vmul.f32 0.03125, %v59_v7  ;;  %v69_v9 = vsel %vm66_vm0, %v62_v6, 0.0 }
  0xad   :  { %v71_v10 = vmul.f32 %v69_v9, %v69_v9 }
  0xae   :  { %v63_v11 = vsub.f32 %v55_v1, %v61_v8 }
  0xaf   :  { %73 = vadd.xlane.f32.xlu1 %v71_v10 }
  0xb0   :  { %v70_v12 = vsel %vm66_vm0, %v63_v11, 0.0 }
  0xb1   :  { %v72_v13 = vmul.f32 %v70_v12, %v70_v12 }
  0xb3   :  { %75 = vadd.xlane.f32.xlu1 %v72_v13 }
 0x138   :  { %v74_v23 = vpop.xlane.xlu1 %73 }
 0x139   :  { %v77_v24 = vmul.f32 0.03125, %v74_v23 }
 0x13b   :  { %v80_v25 = vadd.f32 1e-05, %v77_v24 }
 0x13c   :  { %v76_v26 = vpop.xlane.xlu1 %75 }
 0x13d   :  { %323 = vrsqrt.f32 %v80_v25  ;;  %v78_v27 = vmul.f32 0.03125, %v76_v26 }
 0x13f   :  { %v81_v28 = vadd.f32 1e-05, %v78_v27 }
 0x141   :  { %325 = vrsqrt.f32 %v81_v28 }
 0x14a   :  { %v324_v30 = vpop.eup %323 }
 0x14b   :  { %v90_v31 = vmul.f32 %v324_v30, %v255_v29 }
 0x14d   :  { %v92_v33 = vmul.f32 %v90_v31, %v69_v9 }
 0x14e   :  { %v326_v32 = vpop.eup %325 }
 0x14f   :  { %v91_v34 = vmul.f32 %v326_v32, %v255_v29  ;;  %v101_v37 = vadd.f32 %v256_v35, %v92_v33 }
 0x151   :  { %v93_v36 = vmul.f32 %v91_v34, %v70_v12 }
 0x153   :  { %v102_v38 = vadd.f32 %v256_v35, %v93_v36 }
 0x155   :  { %v274_v39 = vpack.c.bf16 %v102_v38, %v101_v37 }
 0x157   :  { %275 = vst [vmem:[#allocation2] sm:$0xff] %v274_v39  }
 0x15e   :  { %v322_v40 = vld [vmem:[#allocation2] sm:$0xff]  }
 0x15f   :  { %302 = vmatmul.mubr.bf16.vlgmr.msra.gmra.mxu0 %v322_v40 }
 0x21f   :  { %v226_v42 = vpop.f32.mrf.mxu0 }
 0x220   :  { %v227_v43 = vadd.f32 %v259_v41, %v226_v42 }
 0x221   :  { %v303_v44 = vpop.f32.mrf.mxu0 }
 0x222   :  { %v233_v45 = vmax.f32 %v227_v43, 0.0 }
 0x223   :  { %v229_v46 = vpop.f32.mrf.mxu0 }
 0x224   :  { %235 = vst [vmem:[#allocation8] sm:$0xff] %v233_v45  ;;  %v230_v47 = vadd.f32 %v259_v41, %v229_v46 }
 0x225   :  { %v304_v48 = vpop.f32.mrf.mxu0 }
 0x226   :  { %v234_v49 = vmax.f32 %v230_v47, 0.0 }
 0x228   :  { %236 = vst [vmem:[#allocation8 + $0x8] sm:$0xff] %v234_v49 }
 0x229   :  { %378 = shalt.err (!%p375_p0)
}
 0x22a   :  { %248 = dma.vmem_to_hbm [thread:$0]  %s243_s11, 256, %s461_s5, [#allocation5], %s394_s21, %s394_s21, %s395_s22  }
 0x22b   :  { %391 = dma.done.wait [#allocation5], 256  }
 0x22c   :  { %392 = vsyncadd [#allocation5], 4294967040 }
 0x22d   :  { %252 = vsyncpa [#allocation4], 1 }
 0x22e   :  { %253 = vsyncpa [#allocation7], 1 }
 0x22f   :  { %254 = vsyncpa [#allocation5], 1 }

</bundles_post_ra>
